<compile_context>
chip_gen: v6e
topology: v6e:2x2x1
jax: 0.10.0
libtpu: 0.0.40
codegen_flags: <defaults>
</compile_context>

<pallas_src>
import jax
import jax.numpy as jnp
from jax.experimental import pallas as pl
from jax.experimental.pallas import tpu as pltpu


def _round_up(v: int, m: int) -> int:
    return ((v + m - 1) // m) * m


def combined_kernel(x_ref, w1_ref, b1_ref, w2_ref, b2_ref, o_ref):
    # base_model: Linear + ReLU  (bf16 MXU inputs, f32 accumulation).
    # x is streamed as f32 and cast here (cheap VPU pack, saves a wrapper pass).
    x = x_ref[...].astype(jnp.bfloat16)
    feats = jnp.dot(x, w1_ref[...], preferred_element_type=jnp.float32)
    feats = jnp.maximum(feats + b1_ref[...], 0.0)
    # classification_head: Linear.  feats feeds the MXU directly (no scratch
    # round-trip; at these tile sizes it is only a handful of vregs).
    logits = jnp.dot(feats.astype(jnp.bfloat16), w2_ref[...],
                     preferred_element_type=jnp.float32)
    o_ref[...] = (logits + b2_ref[...]).astype(o_ref.dtype)


def _choose_tiling(batch: int, tile_m_cap: int):
    """Returns (tile_m, batch_p, n_tiles). Single tile whenever it fits."""
    if batch <= tile_m_cap:
        # grid=(1,), block == full array: no batch padding, no (8,128) issue.
        return batch, batch, 1
    batch8 = _round_up(batch, 8)
    n_tiles = -(-batch8 // tile_m_cap)                    # ceil div
    tile_m = _round_up(-(-batch8 // n_tiles), 8)          # near-equal tiles
    batch_p = tile_m * n_tiles                            # waste < 8*n_tiles rows
    return tile_m, batch_p, n_tiles


def _vmem_budget_bytes(tile_m, in_dim, hid_p, cls_p):
    bf16, f32 = 2, 4
    # Pallas double-buffers every input by default, including the "resident"
    # weights with a constant index_map -- count them at 2x.
    weights = 2 * (in_dim * hid_p * bf16 + hid_p * cls_p * bf16
                   + hid_p * f32 + cls_p * f32)
    x_stream = 2 * tile_m * in_dim * f32                  # streamed x (f32, unpadded)
    out_stream = 2 * tile_m * cls_p * f32                 # streamed output
    live = tile_m * hid_p * (f32 + bf16)                  # feats f32 + bf16 copy
    return weights + x_stream + out_stream + live


def _vmem_cap_bytes() -> int:
    try:
        info = pltpu.get_tpu_info()
        cap = int(getattr(info, "vmem_capacity_bytes", 0))
        if cap > 0:
            return cap
    except Exception:
        pass
    return 64 << 20  # safe default: v7x has the smallest per-TC VMEM


def combined_model(x, w1, b1, w2, b2, *, tile_m_cap=2048):
    """x:(B,in)  w1:(in,hid)  b1:(1,hid)  w2:(hid,cls)  b2:(1,cls) -> (B,cls) f32."""
    batch, in_dim = x.shape
    hidden = w1.shape[1]
    num_classes = w2.shape[1]

    # Lane-dense padding only on the tiny resident weights (one-time cost).
    hid_p = _round_up(hidden, 128)
    cls_p = _round_up(num_classes, 128)

    tile_m, batch_p, n_tiles = _choose_tiling(batch, tile_m_cap)

    # x: no lane padding, no pre-cast.  Row padding only if multi-tile.
    x_p = x if batch_p == batch else jnp.pad(x, ((0, batch_p - batch), (0, 0)))

    w1_p = jnp.pad(w1, ((0, 0), (0, hid_p - hidden))).astype(jnp.bfloat16)
    b1_p = jnp.pad(b1, ((0, 0), (0, hid_p - hidden))).astype(jnp.float32)
    w2_p = jnp.pad(w2, ((0, hid_p - hidden), (0, cls_p - num_classes))).astype(jnp.bfloat16)
    b2_p = jnp.pad(b2, ((0, 0), (0, cls_p - num_classes))).astype(jnp.float32)

    budget = _vmem_budget_bytes(tile_m, in_dim, hid_p, cls_p)
    cap = _vmem_cap_bytes()
    vmem_limit = min(max(int(budget * 1.25) + (4 << 20), 16 << 20),
                     int(cap * 0.9))

    out_p = pl.pallas_call(
        combined_kernel,
        out_shape=jax.ShapeDtypeStruct((batch_p, cls_p), jnp.float32),
        grid_spec=pltpu.PrefetchScalarGridSpec(
            num_scalar_prefetch=0,
            grid=(n_tiles,),
            in_specs=[
                pl.BlockSpec((tile_m, in_dim), lambda i: (i, 0)),   # x (streamed, unpadded lanes)
                pl.BlockSpec((in_dim, hid_p), lambda i: (0, 0)),    # W1 (resident)
                pl.BlockSpec((1, hid_p), lambda i: (0, 0)),         # b1 (resident)
                pl.BlockSpec((hid_p, cls_p), lambda i: (0, 0)),     # W2 (resident)
                pl.BlockSpec((1, cls_p), lambda i: (0, 0)),         # b2 (resident)
            ],
            out_specs=pl.BlockSpec((tile_m, cls_p), lambda i: (i, 0)),  # 128-lane unmasked vst
        ),
        compiler_params=pltpu.CompilerParams(
            dimension_semantics=("parallel",),
            vmem_limit_bytes=vmem_limit,
        ),
    )(x_p, w1_p, b1_p, w2_p, b2_p)

    # Slice padding off outside the kernel (class-dim padding only at these shapes).
    return out_p[:batch, :num_classes]


def reference_f32(x, w1, b1, w2, b2):
    feats = jnp.maximum(x @ w1 + b1, 0.0)
    return feats @ w2 + b2


def reference_bf16(x, w1, b1, w2, b2):
    # Same numerics as the kernel: bf16 MXU inputs, f32 accumulation.
    xb, w1b, w2b = (a.astype(jnp.bfloat16) for a in (x, w1, w2))
    feats = jnp.maximum(
        jnp.dot(xb, w1b, preferred_element_type=jnp.float32) + b1, 0.0
    )
    return jnp.dot(feats.astype(jnp.bfloat16), w2b,
                   preferred_element_type=jnp.float32) + b2


if __name__ == "__main__":
    # Small, deterministic shapes consistent with the forward pass.
    batch, in_dim, hidden, num_classes = 256, 32, 64, 16

    key = jax.random.PRNGKey(0)
    kx, kw1, kb1, kw2, kb2 = jax.random.split(key, 5)

    x = jax.random.normal(kx, (batch, in_dim), dtype=jnp.float32)
    w1 = jax.random.normal(kw1, (in_dim, hidden), dtype=jnp.float32) * 0.1
    b1 = jax.random.normal(kb1, (1, hidden), dtype=jnp.float32) * 0.1
    w2 = jax.random.normal(kw2, (hidden, num_classes), dtype=jnp.float32) * 0.1
    b2 = jax.random.normal(kb2, (1, num_classes), dtype=jnp.float32) * 0.1

    logits = combined_model(x, w1, b1, w2, b2)
    logits = jax.block_until_ready(logits)

    assert logits.shape == (batch, num_classes)
    # Tight check against a bit-equivalent bf16/f32-accumulate reference.
    ref_bf16 = reference_bf16(x, w1, b1, w2, b2)
    assert jnp.allclose(logits, ref_bf16, atol=1e-3, rtol=1e-3)
    # Loose check against the pure-f32 module semantics.
    ref_f32 = reference_f32(x, w1, b1, w2, b2)
    assert jnp.allclose(logits, ref_f32, atol=5e-2, rtol=5e-2)

    print("KERNEL_OK")
</pallas_src>

<mosaic_0001>
module attributes {stable_mosaic.version = 11 : i64} {
  func.func @combined_kernel(%arg0: i32, %arg1: memref<256x32xf32, #tpu.memory_space<vmem>>, %arg2: memref<32x128xbf16, #tpu.memory_space<vmem>>, %arg3: memref<1x128xf32, #tpu.memory_space<vmem>>, %arg4: memref<128x128xbf16, #tpu.memory_space<vmem>>, %arg5: memref<1x128xf32, #tpu.memory_space<vmem>>, %arg6: memref<256x128xf32, #tpu.memory_space<vmem>>) attributes {dimension_semantics = [#tpu.dimension_semantics<parallel>], iteration_bounds = array<i64: 1>, scalar_prefetch = 0 : i64, scratch_operands = 0 : i64, tpu.core_type = #tpu.core_type<tc>, window_params = [{transform_indices = @transform_0, window_bounds = array<i64: 256, 32>}, {pipeline_mode = #tpu.pipeline_mode<synchronous>, transform_indices = @transform_1, window_bounds = array<i64: 32, 128>}, {pipeline_mode = #tpu.pipeline_mode<synchronous>, transform_indices = @transform_2, window_bounds = array<i64: 1, 128>}, {pipeline_mode = #tpu.pipeline_mode<synchronous>, transform_indices = @transform_3, window_bounds = array<i64: 128, 128>}, {pipeline_mode = #tpu.pipeline_mode<synchronous>, transform_indices = @transform_4, window_bounds = array<i64: 1, 128>}, {transform_indices = @transform_5, window_bounds = array<i64: 256, 128>}]} {
    %c0 = arith.constant 0 : index
    %c0_0 = arith.constant 0 : index
    %0 = vector.load %arg1[%c0, %c0_0] : memref<256x32xf32, #tpu.memory_space<vmem>>, vector<256x32xf32>
    %1 = arith.truncf %0 : vector<256x32xf32> to vector<256x32xbf16>
    %c0_1 = arith.constant 0 : index
    %c0_2 = arith.constant 0 : index
    %2 = vector.load %arg2[%c0_1, %c0_2] : memref<32x128xbf16, #tpu.memory_space<vmem>>, vector<32x128xbf16>
    %cst = arith.constant dense<0.000000e+00> : vector<256x128xf32>
    %3 = tpu.matmul %1, %2, %cst {dimension_numbers = #tpu.dot_dimension_numbers<[1], [0], [0], [1], [0, 0, 1, 1], [], []>} : vector<256x32xbf16>, vector<32x128xbf16>, vector<256x128xf32> -> vector<256x128xf32>
    %c0_3 = arith.constant 0 : index
    %c0_4 = arith.constant 0 : index
    %4 = vector.load %arg3[%c0_3, %c0_4] : memref<1x128xf32, #tpu.memory_space<vmem>>, vector<1x128xf32>
    %5 = vector.broadcast %4 : vector<1x128xf32> to vector<256x128xf32>
    %6 = arith.addf %3, %5 : vector<256x128xf32>
    %cst_5 = arith.constant 0.000000e+00 : f32
    %7 = vector.broadcast %cst_5 : f32 to vector<256x128xf32>
    %8 = arith.maximumf %6, %7 : vector<256x128xf32>
    %9 = arith.truncf %8 : vector<256x128xf32> to vector<256x128xbf16>
    %c0_6 = arith.constant 0 : index
    %c0_7 = arith.constant 0 : index
    %10 = vector.load %arg4[%c0_6, %c0_7] : memref<128x128xbf16, #tpu.memory_space<vmem>>, vector<128x128xbf16>
    %cst_8 = arith.constant dense<0.000000e+00> : vector<256x128xf32>
    %11 = tpu.matmul %9, %10, %cst_8 {dimension_numbers = #tpu.dot_dimension_numbers<[1], [0], [0], [1], [0, 0, 1, 1], [], []>} : vector<256x128xbf16>, vector<128x128xbf16>, vector<256x128xf32> -> vector<256x128xf32>
    %c0_9 = arith.constant 0 : index
    %c0_10 = arith.constant 0 : index
    %12 = vector.load %arg5[%c0_9, %c0_10] : memref<1x128xf32, #tpu.memory_space<vmem>>, vector<1x128xf32>
    %13 = vector.broadcast %12 : vector<1x128xf32> to vector<256x128xf32>
    %14 = arith.addf %11, %13 : vector<256x128xf32>
    %c0_11 = arith.constant 0 : index
    %c0_12 = arith.constant 0 : index
    %15 = vector.load %arg6[%c0_11, %c0_12] : memref<256x128xf32, #tpu.memory_space<vmem>>, vector<256x128xf32>
    tpu.vector_store %arg6[%c0_11, %c0_12], %14 {strides = array<i32>} : memref<256x128xf32, #tpu.memory_space<vmem>>, vector<256x128xf32>,
    return
  }
  func.func @transform_0(%arg0: i32) -> (i32, i32) {
    %c0_i32 = arith.constant 0 : i32
    %c0_i32_0 = arith.constant 0 : i32
    return %arg0, %c0_i32 : i32, i32
  }
  func.func @transform_1(%arg0: i32) -> (i32, i32) {
    %c0_i32 = arith.constant 0 : i32
    %c0_i32_0 = arith.constant 0 : i32
    %c0_i32_1 = arith.constant 0 : i32
    return %c0_i32, %c0_i32_0 : i32, i32
  }
  func.func @transform_2(%arg0: i32) -> (i32, i32) {
    %c0_i32 = arith.constant 0 : i32
    %c0_i32_0 = arith.constant 0 : i32
    %c0_i32_1 = arith.constant 0 : i32
    return %c0_i32, %c0_i32_0 : i32, i32
  }
  func.func @transform_3(%arg0: i32) -> (i32, i32) {
    %c0_i32 = arith.constant 0 : i32
    %c0_i32_0 = arith.constant 0 : i32
    %c0_i32_1 = arith.constant 0 : i32
    return %c0_i32, %c0_i32_0 : i32, i32
  }
  func.func @transform_4(%arg0: i32) -> (i32, i32) {
    %c0_i32 = arith.constant 0 : i32
    %c0_i32_0 = arith.constant 0 : i32
    %c0_i32_1 = arith.constant 0 : i32
    return %c0_i32, %c0_i32_0 : i32, i32
  }
  func.func @transform_5(%arg0: i32) -> (i32, i32) {
    %c0_i32 = arith.constant 0 : i32
    %c0_i32_0 = arith.constant 0 : i32
    return %arg0, %c0_i32 : i32, i32
  }
}

</mosaic_0001>

<bundles_post_ra>
// kernel: tpu_custom_call.1
= control target key start
LH: loop header
LB: loop body
LE: loop exit
PB: predicated region body
PF: predicated region fallthrough
CT: control target
= control target key end

     0   :  { %vm93_vm0 = vcmask 261120   ;;  %s1088_s0 = inlined_call_operand.vmem [shape: f32[256,32], index: 0, kind: input, shape index: {}]   ;;  %s1089_s1 = inlined_call_operand.vmem [shape: bf16[32,128], index: 1, kind: input, shape index: {}]   ;;  %s1090_s2 = inlined_call_operand.vmem [shape: f32[1,128], index: 2, kind: input, shape index: {}]   ;;  %s1091_s3 = inlined_call_operand.vmem [shape: bf16[128,128], index: 3, kind: input, shape index: {}]   ;;  %s1092_s4 = inlined_call_operand.vmem [shape: f32[1,128], index: 4, kind: input, shape index: {}]   ;;  %s1093_s5 = inlined_call_operand.hbm [shape: f32[256,128], index: 5, kind: output, shape index: {}]  }
   0x1   :  { %v804_v0 = vld [vmem:[%s1089_s1 + $0x8] sm:$0xff]   ;;  %v805_v1 = vld [vmem:[%s1089_s1] sm:$0xff]   ;;  %v24_v5 = vld [vmem:[%s1088_s0 + $0x10] sm:$0xff] }
   0x2   :  { %701 = vmatprep.subr.bf16.mxu0 %v804_v0  ;;  %v22_v2 = vld [vmem:[%s1088_s0] sm:$0xff]  ;;  %v23_v3 = vld [vmem:[%s1088_s0 + $0x8] sm:$0xff]  ;;  %v25_v6 = vld [vmem:[%s1088_s0 + $0x18] sm:$0xff] }
   0x3   :  { %702 = vmatpush3.bf16.msra.mxu0 %v804_v0  ;;  %v54_v4 = vpack.c.bf16 %v23_v3, %v22_v2  ;;  %v26_v7 = vld [vmem:[%s1088_s0 + $0x20] sm:$0xff]  ;;  %v27_v8 = vld [vmem:[%s1088_s0 + $0x28] sm:$0xff]  ;;  %v55_v9 = vpack.c.bf16 %v25_v6, %v24_v5  ;;  %v28_v11 = vld [vmem:[%s1088_s0 + $0x30] sm:$0xff] }
   0x4   :  { %703 = vmatprep.subr.bf16.mxu0 %v805_v1  ;;  %v56_v10 = vpack.c.bf16 %v27_v8, %v26_v7  ;;  %v29_v12 = vld [vmem:[%s1088_s0 + $0x38] sm:$0xff]  ;;  %v30_v13 = vld [vmem:[%s1088_s0 + $0x40] sm:$0xff]  ;;  %v31_v14 = vld [vmem:[%s1088_s0 + $0x48] sm:$0xff] }
   0x5   :  { %705 = vmatprep.mubr.msk.bf16.mxu0 %vm93_vm0, %v54_v4  ;;  %v806_v15 = vld [vmem:[%s1091_s3 + $0x38] sm:$0xff]   ;;  %v57_v16 = vpack.c.bf16 %v29_v12, %v28_v11  ;;  %v807_v17 = vld [vmem:[%s1091_s3 + $0x30] sm:$0xff]   ;;  %v58_v18 = vpack.c.bf16 %v31_v14, %v30_v13  ;;  %v808_v21 = vld [vmem:[%s1091_s3 + $0x28] sm:$0xff]  }
   0x6   :  { %785 = vmatprep.subr.bf16.mxu1 %v806_v15  ;;  %v32_v19 = vld [vmem:[%s1088_s0 + $0x50] sm:$0xff]  ;;  %v33_v20 = vld [vmem:[%s1088_s0 + $0x58] sm:$0xff] }
   0x7   :  { %704 = vmatpush3.bf16.msra.mxu0 %v805_v1  ;;  %793 = vmatpush3.bf16.msra.mxu1 %v806_v15 }
   0x8   :  { %737 = vmatprep.subr.bf16.mxu0 %v806_v15  ;;  %786 = vmatprep.subr.bf16.mxu1 %v807_v17 }
   0xa   :  { %706 = vmatmul.mubr.msk.bf16.vlgmr.msra.gmra.mxu0 %vm93_vm0, %v55_v9 }
   0xb   :  { %709 = vmatprep.mubr.msk.bf16.mxu0 %vm93_vm0, %v56_v10  ;;  %738 = vmatpush3.bf16.msra.mxu0 %v806_v15 }
   0xc   :  { %739 = vmatprep.subr.bf16.mxu0 %v807_v17 }
  0x12   :  { %710 = vmatmul.mubr.msk.bf16.gmra.mxu0 %vm93_vm0, %v57_v16 }
  0x13   :  { %713 = vmatprep.mubr.msk.bf16.mxu0 %vm93_vm0, %v58_v18 }
  0x14   :  { %10 = vsyncpa [#allocation3], 0  ;;  %v34_v22 = vld [vmem:[%s1088_s0 + $0x60] sm:$0xff]  ;;  %v35_v23 = vld [vmem:[%s1088_s0 + $0x68] sm:$0xff]  ;;  %740 = vmatpush3.bf16.msra.mxu0 %v807_v17  ;;  %794 = vmatpush3.bf16.msra.mxu1 %v807_v17  ;;  %v59_v25 = vpack.c.bf16 %v33_v20, %v32_v19 }
  0x15   :  { %741 = vmatprep.subr.bf16.mxu0 %v808_v21  ;;  %v809_v24 = vld [vmem:[%s1091_s3 + $0x20] sm:$0xff]   ;;  %787 = vmatprep.subr.bf16.mxu1 %v808_v21  ;;  %v60_v26 = vpack.c.bf16 %v35_v23, %v34_v22  ;;  %v810_v27 = vld [vmem:[%s1091_s3 + $0x18] sm:$0xff]   ;;  %v36_v28 = vld [vmem:[%s1088_s0 + $0x70] sm:$0xff] }
  0x16   :  { %v37_v29 = vld [vmem:[%s1088_s0 + $0x78] sm:$0xff]  ;;  %v38_v30 = vld [vmem:[%s1088_s0 + $0x80] sm:$0xff]  ;;  %v39_v31 = vld [vmem:[%s1088_s0 + $0x88] sm:$0xff] }
  0x17   :  { %v61_v32 = vpack.c.bf16 %v37_v29, %v36_v28  ;;  %v62_v33 = vpack.c.bf16 %v39_v31, %v38_v30  ;;  %v40_v34 = vld [vmem:[%s1088_s0 + $0x90] sm:$0xff]  ;;  %v41_v35 = vld [vmem:[%s1088_s0 + $0x98] sm:$0xff]  ;;  %v42_v36 = vld [vmem:[%s1088_s0 + $0xa0] sm:$0xff] }
  0x18   :  { %742 = vmatpush3.bf16.msra.mxu0 %v808_v21  ;;  %795 = vmatpush3.bf16.msra.mxu1 %v808_v21  ;;  %v43_v37 = vld [vmem:[%s1088_s0 + $0xa8] sm:$0xff]  ;;  %v63_v38 = vpack.c.bf16 %v41_v35, %v40_v34  ;;  %v44_v40 = vld [vmem:[%s1088_s0 + $0xb0] sm:$0xff]  ;;  %v45_v41 = vld [vmem:[%s1088_s0 + $0xb8] sm:$0xff] }
  0x19   :  { %743 = vmatprep.subr.bf16.mxu0 %v809_v24  ;;  %788 = vmatprep.subr.bf16.mxu1 %v809_v24  ;;  %v64_v39 = vpack.c.bf16 %v43_v37, %v42_v36  ;;  %v46_v42 = vld [vmem:[%s1088_s0 + $0xc0] sm:$0xff]  ;;  %v47_v43 = vld [vmem:[%s1088_s0 + $0xc8] sm:$0xff]  ;;  %v65_v44 = vpack.c.bf16 %v45_v41, %v44_v40  ;;  %v48_v46 = vld [vmem:[%s1088_s0 + $0xd0] sm:$0xff] }
  0x1a   :  { %714 = vmatmul.mubr.msk.bf16.gmra.mxu0 %vm93_vm0, %v59_v25  ;;  %v66_v45 = vpack.c.bf16 %v47_v43, %v46_v42  ;;  %v49_v47 = vld [vmem:[%s1088_s0 + $0xd8] sm:$0xff]  ;;  %v50_v48 = vld [vmem:[%s1088_s0 + $0xe0] sm:$0xff]  ;;  %v51_v49 = vld [vmem:[%s1088_s0 + $0xe8] sm:$0xff] }
  0x1b   :  { %717 = vmatprep.mubr.msk.bf16.mxu0 %vm93_vm0, %v60_v26  ;;  %v67_v50 = vpack.c.bf16 %v49_v47, %v48_v46  ;;  %v68_v51 = vpack.c.bf16 %v51_v49, %v50_v48  ;;  %v52_v52 = vld [vmem:[%s1088_s0 + $0xf0] sm:$0xff]  ;;  %v53_v53 = vld [vmem:[%s1088_s0 + $0xf8] sm:$0xff]  ;;  %v812_v56 = vld [vmem:[%s1091_s3 + $0x8] sm:$0xff]  }
  0x1c   :  { %744 = vmatpush3.bf16.msra.mxu0 %v809_v24  ;;  %796 = vmatpush3.bf16.msra.mxu1 %v809_v24  ;;  %v69_v54 = vpack.c.bf16 %v53_v53, %v52_v52  ;;  %v811_v55 = vld [vmem:[%s1091_s3 + $0x10] sm:$0xff]   ;;  %v813_v57 = vld [vmem:[%s1091_s3] sm:$0xff]  }
  0x1d   :  { %745 = vmatprep.subr.bf16.mxu0 %v810_v27  ;;  %789 = vmatprep.subr.bf16.mxu1 %v810_v27  ;;  %v1014_v60 = vld [vmem:[%s1090_s2] ss:$0 sm:$0xff] }
  0x20   :  { %746 = vmatpush3.bf16.msra.mxu0 %v810_v27  ;;  %797 = vmatpush3.bf16.msra.mxu1 %v810_v27 }
  0x21   :  { %747 = vmatprep.subr.bf16.mxu0 %v811_v55  ;;  %790 = vmatprep.subr.bf16.mxu1 %v811_v55 }
  0x22   :  { %718 = vmatmul.mubr.msk.bf16.gmra.mxu0 %vm93_vm0, %v61_v32 }
  0x23   :  { %721 = vmatprep.mubr.msk.bf16.mxu0 %vm93_vm0, %v62_v33 }
  0x24   :  { %748 = vmatpush3.bf16.msra.mxu0 %v811_v55  ;;  %798 = vmatpush3.bf16.msra.mxu1 %v811_v55 }
  0x25   :  { %749 = vmatprep.subr.bf16.mxu0 %v812_v56  ;;  %791 = vmatprep.subr.bf16.mxu1 %v812_v56 }
  0x28   :  { %750 = vmatpush3.bf16.msra.mxu0 %v812_v56  ;;  %799 = vmatpush3.bf16.msra.mxu1 %v812_v56 }
  0x29   :  { %751 = vmatprep.subr.bf16.mxu0 %v813_v57  ;;  %792 = vmatprep.subr.bf16.mxu1 %v813_v57 }
  0x2a   :  { %722 = vmatmul.mubr.msk.bf16.gmra.mxu0 %vm93_vm0, %v63_v38 }
  0x2b   :  { %725 = vmatprep.mubr.msk.bf16.mxu0 %vm93_vm0, %v64_v39 }
  0x2c   :  { %752 = vmatpush3.bf16.msra.mxu0 %v813_v57  ;;  %800 = vmatpush3.bf16.msra.mxu1 %v813_v57 }
  0x32   :  { %726 = vmatmul.mubr.msk.bf16.gmra.mxu0 %vm93_vm0, %v65_v44 }
  0x33   :  { %729 = vmatprep.mubr.msk.bf16.mxu0 %vm93_vm0, %v66_v45 }
  0x3a   :  { %730 = vmatmul.mubr.msk.bf16.gmra.mxu0 %vm93_vm0, %v67_v50 }
  0x3b   :  { %733 = vmatprep.mubr.msk.bf16.mxu0 %vm93_vm0, %v68_v51 }
  0x42   :  { %734 = vmatmul.mubr.msk.bf16.gmra.mxu0 %vm93_vm0, %v69_v54 }
  0xca   :  { %v707_v58 = vpop.f32.mrf.mxu0 }
  0xcb   :  { %v185_v0 = vadd.f32 %v707_v58, %v1014_v60 }
  0xcc   :  { %v176_v59 = vpop.f32.mrf.mxu0 }
  0xcd   :  { %v177_v62 = vadd.f32 %v1014_v60, %v176_v59  ;;  %v305_v7 = vmax.f32 %v185_v0, 0.0 }
  0xce   :  { %v708_v61 = vpop.f32.mrf.mxu0 }
  0xcf   :  { %v188_v63 = vadd.f32 %v708_v61, %v1014_v60  ;;  %v303_v5 = vmax.f32 %v177_v62, 0.0 }
  0xd0   :  { %v179_v1 = vpop.f32.mrf.mxu0 }
  0xd1   :  { %v180_v2 = vadd.f32 %v1014_v60, %v179_v1  ;;  %v306_v3 = vmax.f32 %v188_v63, 0.0 }
  0xd2   :  { %v711_v4 = vpop.f32.mrf.mxu0 }
  0xd3   :  { %v304_v6 = vmax.f32 %v180_v2, 0.0  ;;  %v336_v10 = vpack.c.bf16 %v306_v3, %v305_v7  ;;  %v201_v14 = vadd.f32 %v711_v4, %v1014_v60 }
  0xd4   :  { %v192_v8 = vpop.f32.mrf.mxu0 }
  0xd5   :  { %v335_v9 = vpack.c.bf16 %v304_v6, %v303_v5  ;;  %v193_v12 = vadd.f32 %v1014_v60, %v192_v8  ;;  %v309_v21 = vmax.f32 %v201_v14, 0.0 }
  0xd6   :  { %v712_v11 = vpop.f32.mrf.mxu0 }
  0xd7   :  { %v204_v13 = vadd.f32 %v712_v11, %v1014_v60  ;;  %753 = vmatprep.mubr.bf16.mxu0 %v335_v9  ;;  %v307_v19 = vmax.f32 %v193_v12, 0.0 }
  0xd8   :  { %v195_v15 = vpop.f32.mrf.mxu0  ;;  %754 = vmatmul.mubr.bf16.vlgmr.msra.gmra.mxu0 %v336_v10 }
  0xd9   :  { %v196_v16 = vadd.f32 %v1014_v60, %v195_v15  ;;  %v310_v17 = vmax.f32 %v204_v13, 0.0 }
  0xda   :  { %v715_v18 = vpop.f32.mrf.mxu0 }
  0xdb   :  { %v308_v20 = vmax.f32 %v196_v16, 0.0  ;;  %v338_v24 = vpack.c.bf16 %v310_v17, %v309_v21  ;;  %v217_v28 = vadd.f32 %v715_v18, %v1014_v60 }
  0xdc   :  { %v208_v22 = vpop.f32.mrf.mxu0 }
  0xdd   :  { %v337_v23 = vpack.c.bf16 %v308_v20, %v307_v19  ;;  %v209_v26 = vadd.f32 %v1014_v60, %v208_v22  ;;  %v313_v35 = vmax.f32 %v217_v28, 0.0 }
  0xde   :  { %v716_v25 = vpop.f32.mrf.mxu0 }
  0xdf   :  { %v220_v27 = vadd.f32 %v716_v25, %v1014_v60  ;;  %757 = vmatprep.mubr.bf16.mxu1 %v337_v23  ;;  %v311_v33 = vmax.f32 %v209_v26, 0.0 }
  0xe0   :  { %v211_v29 = vpop.f32.mrf.mxu0  ;;  %758 = vmatmul.mubr.bf16.vlgmr.msra.gmra.mxu1 %v338_v24 }
  0xe1   :  { %v212_v30 = vadd.f32 %v1014_v60, %v211_v29  ;;  %v314_v31 = vmax.f32 %v220_v27, 0.0 }
  0xe2   :  { %v719_v32 = vpop.f32.mrf.mxu0 }
  0xe3   :  { %v312_v34 = vmax.f32 %v212_v30, 0.0  ;;  %v340_v38 = vpack.c.bf16 %v314_v31, %v313_v35  ;;  %v233_v42 = vadd.f32 %v719_v32, %v1014_v60 }
  0xe4   :  { %v224_v36 = vpop.f32.mrf.mxu0 }
  0xe5   :  { %v339_v37 = vpack.c.bf16 %v312_v34, %v311_v33  ;;  %v225_v40 = vadd.f32 %v1014_v60, %v224_v36  ;;  %v317_v49 = vmax.f32 %v233_v42, 0.0 }
  0xe6   :  { %v720_v39 = vpop.f32.mrf.mxu0 }
  0xe7   :  { %v236_v41 = vadd.f32 %v720_v39, %v1014_v60  ;;  %761 = vmatprep.mubr.bf16.mxu1 %v339_v37  ;;  %v315_v47 = vmax.f32 %v225_v40, 0.0 }
  0xe8   :  { %v227_v43 = vpop.f32.mrf.mxu0  ;;  %762 = vmatmul.mubr.bf16.gmra.mxu1 %v340_v38 }
  0xe9   :  { %v228_v44 = vadd.f32 %v1014_v60, %v227_v43  ;;  %v318_v45 = vmax.f32 %v236_v41, 0.0 }
  0xea   :  { %v723_v46 = vpop.f32.mrf.mxu0 }
  0xeb   :  { %v316_v48 = vmax.f32 %v228_v44, 0.0  ;;  %v342_v52 = vpack.c.bf16 %v318_v45, %v317_v49  ;;  %v249_v56 = vadd.f32 %v723_v46, %v1014_v60  ;;  %v1051_v44 = vld [vmem:[%s1092_s4] ss:$0 sm:$0xff]  ;;  %s836_s4 = smov [#allocation2]  }
  0xec   :  { %v240_v50 = vpop.f32.mrf.mxu0  ;;  %s620_s25 = sshll.u32 %s836_s4, 4  ;;  %s621_s25 = int_to_ptr.vmem [resolvable:$true] %s620_s25 }
  0xed   :  { %v341_v51 = vpack.c.bf16 %v316_v48, %v315_v47  ;;  %v241_v54 = vadd.f32 %v1014_v60, %v240_v50  ;;  %v321_v0 = vmax.f32 %v249_v56, 0.0  ;;  %s814_s26 = scalar_lea.vmem %s621_s25, 4096  ;;  %p819_p1 = scmp.lt.s32.totalorder %s621_s25, %s621_s25 }
  0xee   :  { %v724_v53 = vpop.f32.mrf.mxu0  ;;  %p815_p0 = scmp.ne.s32.totalorder %s621_s25, %s814_s26  ;;  %p820_p2 = scmp.lt.s32.totalorder %s814_s26, %s814_s26 }
  0xef   :  { %v252_v55 = vadd.f32 %v724_v53, %v1014_v60  ;;  %765 = vmatprep.mubr.bf16.mxu1 %v341_v51  ;;  %v319_v62 = vmax.f32 %v241_v54, 0.0 }
  0xf0   :  { %v243_v57 = vpop.f32.mrf.mxu0  ;;  %766 = vmatmul.mubr.bf16.gmra.mxu1 %v342_v52  ;;  %p821_p3 = por %p820_p2, %p819_p1 }
  0xf1   :  { %v244_v58 = vadd.f32 %v1014_v60, %v243_v57  ;;  %v322_v59 = vmax.f32 %v252_v55, 0.0 }
  0xf2   :  { %v727_v61 = vpop.f32.mrf.mxu0  ;;  %p822_p4 = pnand %p821_p3, %p815_p0 }
  0xf3   :  { %v320_v63 = vmax.f32 %v244_v58, 0.0  ;;  %v344_v3 = vpack.c.bf16 %v322_v59, %v321_v0  ;;  %v265_v7 = vadd.f32 %v727_v61, %v1014_v60 }
  0xf4   :  { %v256_v1 = vpop.f32.mrf.mxu0 }
  0xf5   :  { %v343_v2 = vpack.c.bf16 %v320_v63, %v319_v62  ;;  %v257_v5 = vadd.f32 %v1014_v60, %v256_v1  ;;  %v325_v14 = vmax.f32 %v265_v7, 0.0 }
  0xf6   :  { %v728_v4 = vpop.f32.mrf.mxu0 }
  0xf7   :  { %v268_v6 = vadd.f32 %v728_v4, %v1014_v60  ;;  %769 = vmatprep.mubr.bf16.mxu1 %v343_v2  ;;  %v323_v12 = vmax.f32 %v257_v5, 0.0 }
  0xf8   :  { %v259_v8 = vpop.f32.mrf.mxu0  ;;  %770 = vmatmul.mubr.bf16.gmra.mxu1 %v344_v3 }
  0xf9   :  { %v260_v9 = vadd.f32 %v1014_v60, %v259_v8  ;;  %v326_v10 = vmax.f32 %v268_v6, 0.0 }
  0xfa   :  { %v731_v11 = vpop.f32.mrf.mxu0 }
  0xfb   :  { %v324_v13 = vmax.f32 %v260_v9, 0.0  ;;  %v346_v17 = vpack.c.bf16 %v326_v10, %v325_v14  ;;  %v281_v21 = vadd.f32 %v731_v11, %v1014_v60 }
  0xfc   :  { %v272_v15 = vpop.f32.mrf.mxu0 }
  0xfd   :  { %v345_v16 = vpack.c.bf16 %v324_v13, %v323_v12  ;;  %v273_v19 = vadd.f32 %v1014_v60, %v272_v15  ;;  %v329_v28 = vmax.f32 %v281_v21, 0.0 }
  0xfe   :  { %v732_v18 = vpop.f32.mrf.mxu0 }
  0xff   :  { %v284_v20 = vadd.f32 %v732_v18, %v1014_v60  ;;  %773 = vmatprep.mubr.bf16.mxu1 %v345_v16  ;;  %v327_v26 = vmax.f32 %v273_v19, 0.0 }
 0x100   :  { %v275_v22 = vpop.f32.mrf.mxu0  ;;  %774 = vmatmul.mubr.bf16.gmra.mxu1 %v346_v17 }
 0x101   :  { %v276_v23 = vadd.f32 %v1014_v60, %v275_v22  ;;  %v330_v24 = vmax.f32 %v284_v20, 0.0 }
 0x102   :  { %v735_v25 = vpop.f32.mrf.mxu0 }
 0x103   :  { %v328_v27 = vmax.f32 %v276_v23, 0.0  ;;  %v348_v31 = vpack.c.bf16 %v330_v24, %v329_v28  ;;  %v297_v35 = vadd.f32 %v735_v25, %v1014_v60 }
 0x104   :  { %v288_v29 = vpop.f32.mrf.mxu0 }
 0x105   :  { %v347_v30 = vpack.c.bf16 %v328_v27, %v327_v26  ;;  %v289_v33 = vadd.f32 %v1014_v60, %v288_v29  ;;  %v333_v41 = vmax.f32 %v297_v35, 0.0 }
 0x106   :  { %v736_v32 = vpop.f32.mrf.mxu0 }
 0x107   :  { %v300_v34 = vadd.f32 %v736_v32, %v1014_v60  ;;  %777 = vmatprep.mubr.bf16.mxu1 %v347_v30  ;;  %v331_v39 = vmax.f32 %v289_v33, 0.0 }
 0x108   :  { %v291_v36 = vpop.f32.mrf.mxu0  ;;  %778 = vmatmul.mubr.bf16.gmra.mxu1 %v348_v31 }
 0x109   :  { %v292_v37 = vadd.f32 %v1014_v60, %v291_v36  ;;  %v334_v38 = vmax.f32 %v300_v34, 0.0 }
 0x10b   :  { %v332_v40 = vmax.f32 %v292_v37, 0.0  ;;  %v350_v43 = vpack.c.bf16 %v334_v38, %v333_v41 }
 0x10d   :  { %v349_v42 = vpack.c.bf16 %v332_v40, %v331_v39 }
 0x10f   :  { %781 = vmatprep.mubr.bf16.mxu1 %v349_v42 }
 0x110   :  { %782 = vmatmul.mubr.bf16.gmra.mxu1 %v350_v43 }
 0x198   :  { %v755_v45 = vpop.f32.mrf.mxu0 }
 0x199   :  { %v465_v46 = vadd.f32 %v755_v45, %v1051_v44 }
 0x19a   :  { %v456_v47 = vpop.f32.mrf.mxu0 }
 0x19b   :  { %585 = vst [vmem:[#allocation2 + $0x10] sm:$0xff] %v465_v46  ;;  %v457_v60 = vadd.f32 %v1051_v44, %v456_v47 }
 0x19c   :  { %v756_v48 = vpop.f32.mrf.mxu0 }
 0x19d   :  { %583 = vst [vmem:[#allocation2] sm:$0xff] %v457_v60  ;;  %v468_v49 = vadd.f32 %v756_v48, %v1051_v44 }
 0x19e   :  { %v459_v50 = vpop.f32.mrf.mxu0 }
 0x19f   :  { %586 = vst [vmem:[#allocation2 + $0x18] sm:$0xff] %v468_v49  ;;  %v460_v51 = vadd.f32 %v1051_v44, %v459_v50 }
 0x1a0   :  { %v759_v52 = vpop.f32.mrf.mxu1 }
 0x1a1   :  { %584 = vst [vmem:[#allocation2 + $0x8] sm:$0xff] %v460_v51  ;;  %v481_v53 = vadd.f32 %v759_v52, %v1051_v44 }
 0x1a2   :  { %v472_v54 = vpop.f32.mrf.mxu1 }
 0x1a3   :  { %589 = vst [vmem:[#allocation2 + $0x30] sm:$0xff] %v481_v53  ;;  %v473_v55 = vadd.f32 %v1051_v44, %v472_v54 }
 0x1a4   :  { %v760_v56 = vpop.f32.mrf.mxu1 }
 0x1a5   :  { %587 = vst [vmem:[#allocation2 + $0x20] sm:$0xff] %v473_v55  ;;  %v484_v57 = vadd.f32 %v760_v56, %v1051_v44 }
 0x1a6   :  { %v475_v58 = vpop.f32.mrf.mxu1 }
 0x1a7   :  { %590 = vst [vmem:[#allocation2 + $0x38] sm:$0xff] %v484_v57  ;;  %v476_v59 = vadd.f32 %v1051_v44, %v475_v58 }
 0x1a8   :  { %v763_v61 = vpop.f32.mrf.mxu1 }
 0x1a9   :  { %588 = vst [vmem:[#allocation2 + $0x28] sm:$0xff] %v476_v59  ;;  %v497_v62 = vadd.f32 %v763_v61, %v1051_v44 }
 0x1aa   :  { %v488_v63 = vpop.f32.mrf.mxu1 }
 0x1ab   :  { %593 = vst [vmem:[#allocation2 + $0x50] sm:$0xff] %v497_v62  ;;  %v489_v0 = vadd.f32 %v1051_v44, %v488_v63 }
 0x1ac   :  { %v764_v1 = vpop.f32.mrf.mxu1 }
 0x1ad   :  { %591 = vst [vmem:[#allocation2 + $0x40] sm:$0xff] %v489_v0  ;;  %v500_v2 = vadd.f32 %v764_v1, %v1051_v44 }
 0x1ae   :  { %v491_v3 = vpop.f32.mrf.mxu1 }
 0x1af   :  { %594 = vst [vmem:[#allocation2 + $0x58] sm:$0xff] %v500_v2  ;;  %v492_v4 = vadd.f32 %v1051_v44, %v491_v3 }
 0x1b0   :  { %v767_v5 = vpop.f32.mrf.mxu1 }
 0x1b1   :  { %592 = vst [vmem:[#allocation2 + $0x48] sm:$0xff] %v492_v4  ;;  %v513_v6 = vadd.f32 %v767_v5, %v1051_v44 }
 0x1b2   :  { %v504_v7 = vpop.f32.mrf.mxu1 }
 0x1b3   :  { %597 = vst [vmem:[#allocation2 + $0x70] sm:$0xff] %v513_v6  ;;  %v505_v8 = vadd.f32 %v1051_v44, %v504_v7 }
 0x1b4   :  { %v768_v9 = vpop.f32.mrf.mxu1 }
 0x1b5   :  { %595 = vst [vmem:[#allocation2 + $0x60] sm:$0xff] %v505_v8  ;;  %v516_v10 = vadd.f32 %v768_v9, %v1051_v44 }
 0x1b6   :  { %v507_v11 = vpop.f32.mrf.mxu1 }
 0x1b7   :  { %598 = vst [vmem:[#allocation2 + $0x78] sm:$0xff] %v516_v10  ;;  %v508_v12 = vadd.f32 %v1051_v44, %v507_v11 }
 0x1b8   :  { %v771_v13 = vpop.f32.mrf.mxu1 }
 0x1b9   :  { %596 = vst [vmem:[#allocation2 + $0x68] sm:$0xff] %v508_v12  ;;  %v529_v14 = vadd.f32 %v771_v13, %v1051_v44 }
 0x1ba   :  { %v520_v15 = vpop.f32.mrf.mxu1 }
 0x1bb   :  { %601 = vst [vmem:[#allocation2 + $0x90] sm:$0xff] %v529_v14  ;;  %v521_v16 = vadd.f32 %v1051_v44, %v520_v15 }
 0x1bc   :  { %v772_v17 = vpop.f32.mrf.mxu1 }
 0x1bd   :  { %599 = vst [vmem:[#allocation2 + $0x80] sm:$0xff] %v521_v16  ;;  %v532_v18 = vadd.f32 %v772_v17, %v1051_v44 }
 0x1be   :  { %v523_v19 = vpop.f32.mrf.mxu1 }
 0x1bf   :  { %602 = vst [vmem:[#allocation2 + $0x98] sm:$0xff] %v532_v18  ;;  %v524_v20 = vadd.f32 %v1051_v44, %v523_v19 }
 0x1c0   :  { %v775_v21 = vpop.f32.mrf.mxu1 }
 0x1c1   :  { %600 = vst [vmem:[#allocation2 + $0x88] sm:$0xff] %v524_v20  ;;  %v545_v22 = vadd.f32 %v775_v21, %v1051_v44 }
 0x1c2   :  { %v536_v23 = vpop.f32.mrf.mxu1 }
 0x1c3   :  { %605 = vst [vmem:[#allocation2 + $0xb0] sm:$0xff] %v545_v22  ;;  %v537_v24 = vadd.f32 %v1051_v44, %v536_v23 }
 0x1c4   :  { %v776_v25 = vpop.f32.mrf.mxu1 }
 0x1c5   :  { %603 = vst [vmem:[#allocation2 + $0xa0] sm:$0xff] %v537_v24  ;;  %v548_v26 = vadd.f32 %v776_v25, %v1051_v44 }
 0x1c6   :  { %v539_v27 = vpop.f32.mrf.mxu1 }
 0x1c7   :  { %606 = vst [vmem:[#allocation2 + $0xb8] sm:$0xff] %v548_v26  ;;  %v540_v28 = vadd.f32 %v1051_v44, %v539_v27 }
 0x1c8   :  { %v779_v29 = vpop.f32.mrf.mxu1 }
 0x1c9   :  { %604 = vst [vmem:[#allocation2 + $0xa8] sm:$0xff] %v540_v28  ;;  %v561_v30 = vadd.f32 %v779_v29, %v1051_v44 }
 0x1ca   :  { %v552_v31 = vpop.f32.mrf.mxu1 }
 0x1cb   :  { %609 = vst [vmem:[#allocation2 + $0xd0] sm:$0xff] %v561_v30  ;;  %v553_v32 = vadd.f32 %v1051_v44, %v552_v31 }
 0x1cc   :  { %v780_v33 = vpop.f32.mrf.mxu1 }
 0x1cd   :  { %607 = vst [vmem:[#allocation2 + $0xc0] sm:$0xff] %v553_v32  ;;  %v564_v34 = vadd.f32 %v780_v33, %v1051_v44 }
 0x1ce   :  { %v555_v35 = vpop.f32.mrf.mxu1 }
 0x1cf   :  { %610 = vst [vmem:[#allocation2 + $0xd8] sm:$0xff] %v564_v34  ;;  %v556_v36 = vadd.f32 %v1051_v44, %v555_v35 }
 0x1d0   :  { %v783_v37 = vpop.f32.mrf.mxu1 }
 0x1d1   :  { %608 = vst [vmem:[#allocation2 + $0xc8] sm:$0xff] %v556_v36  ;;  %v577_v38 = vadd.f32 %v783_v37, %v1051_v44 }
 0x1d2   :  { %v568_v39 = vpop.f32.mrf.mxu1 }
 0x1d3   :  { %613 = vst [vmem:[#allocation2 + $0xf0] sm:$0xff] %v577_v38  ;;  %v569_v40 = vadd.f32 %v1051_v44, %v568_v39 }
 0x1d4   :  { %v784_v41 = vpop.f32.mrf.mxu1 }
 0x1d5   :  { %611 = vst [vmem:[#allocation2 + $0xe0] sm:$0xff] %v569_v40  ;;  %v580_v42 = vadd.f32 %v784_v41, %v1051_v44 }
 0x1d6   :  { %v571_v43 = vpop.f32.mrf.mxu1 }
 0x1d7   :  { %614 = vst [vmem:[#allocation2 + $0xf8] sm:$0xff] %v580_v42  ;;  %v572_v45 = vadd.f32 %v1051_v44, %v571_v43 }
 0x1d9   :  { %612 = vst [vmem:[#allocation2 + $0xe8] sm:$0xff] %v572_v45 }
 0x1da   :  { %825 = shalt.err (!%p822_p4)
}
 0x1db   :  { %s837_s27 = smov 128   ;;  %s838_s28 = smov 8  }
 0x1dc   :  { %626 = dma.vmem_to_hbm [thread:$0]  %s621_s25, 4096, %s1093_s5, [#allocation3], %s837_s27, %s837_s27, %s838_s28  }
 0x1dd   :  { %834 = dma.done.wait [#allocation3], 4096  }
 0x1de   :  { %835 = vsyncadd [#allocation3], 4294963200 }
 0x1df   :  { %630 = vsyncpa [#allocation3], 1 }

</bundles_post_ra>
